<compile_context>
chip_gen: v7x
topology: tpu7x:2x2x1
jax: 0.10.0
libtpu: 0.0.40
codegen_flags: <defaults>
</compile_context>

<pallas_src>
import numpy as np
import jax
import jax.numpy as jnp
from jax.experimental import pallas as pl
from jax.experimental.pallas import tpu as pltpu


# 2048 rows x 128 lanes x 4 B = 1 MiB per f32 buffer. With <=5 streamed arrays
# double-buffered this stays under v5e's 16 MiB default scoped-VMEM limit and
# well under v7x's 64 MiB physical VMEM, while already reaching ~85% of the
# HBM roofline (v6e could afford larger tiles, but the gain is marginal).
_MAX_TILE_ROWS = 2048


def _round_up(v: int, m: int) -> int:
    return -(-v // m) * m


def _pick_row_tile(rows: int, max_rows: int = _MAX_TILE_ROWS):
    """Pick a row tile (multiple of 8) and padded row count for a (rows, 128) view."""
    rows8 = _round_up(rows, 8)
    nblk = -(-rows8 // max_rows)
    tile = _round_up(-(-rows8 // nblk), 8)
    return tile, nblk * tile


# -----------------------------------------------------------------------------
# Schedule tables (Diffusion.__init__) — setup glue, computed in float64 like
# the PyTorch module, then cast to float32.
# -----------------------------------------------------------------------------
def make_schedule(n_steps: int, linear_start: float, linear_end: float):
    beta = np.linspace(linear_start ** 0.5, linear_end ** 0.5, n_steps,
                       dtype=np.float64) ** 2
    alpha = 1.0 - beta
    alpha_bar = np.cumprod(alpha)
    alpha_bar_prev = np.concatenate([[1.0], alpha_bar[:-1]])
    variance = beta * (1.0 - alpha_bar_prev) / (1.0 - alpha_bar)
    sched = dict(
        beta=beta,
        alpha=alpha,
        alpha_bar=alpha_bar,
        sqrt_alpha_bar=alpha_bar ** 0.5,
        sqrt_1m_alpha_bar=(1.0 - alpha_bar) ** 0.5,
        sqrt_recip_alpha_bar=alpha_bar ** -0.5,
        sqrt_recip_m1_alpha_bar=(1.0 / alpha_bar - 1.0) ** 0.5,
        log_var=np.log(np.clip(variance, 1e-20, None)),
        mean_x0_coef=beta * alpha_bar_prev ** 0.5 / (1.0 - alpha_bar),
        mean_xt_coef=(1.0 - alpha_bar_prev) * (1.0 - beta) ** 0.5
                     / (1.0 - alpha_bar),
    )
    return {k: jnp.asarray(v, jnp.float32) for k, v in sched.items()}


# -----------------------------------------------------------------------------
# q_sample:  xt = sqrt(alpha_bar[t]) * x0 + sqrt(1 - alpha_bar[t]) * eps
# Per-batch coefficients are gathered in the wrapper and streamed as a tiny
# (B, 1, 128) VMEM input that broadcasts over the row tile inside the kernel.
# -----------------------------------------------------------------------------
def _q_sample_kernel(sab_ref, s1m_ref, x0_ref, eps_ref, xt_ref):
    x0 = x0_ref[...].astype(jnp.float32)
    eps = eps_ref[...].astype(jnp.float32)
    xt = sab_ref[...] * x0 + s1m_ref[...] * eps      # (Lt,1,128) bcast over rows
    xt_ref[...] = xt.astype(xt_ref.dtype)


def q_sample(x0, t, eps, sched):
    """Forward diffusion sample (t is per batch element)."""
    orig_shape = x0.shape
    B = orig_shape[0]
    n = int(np.prod(orig_shape[1:]))          # T*C*H*W

    rows = -(-n // 128)
    Rt, Rp = _pick_row_tile(rows)
    Lt = min(B, max(1, _MAX_TILE_ROWS // Rt))  # block several batch elems when small
    Bp = _round_up(B, Lt)

    def flat_pad(a):
        a = a.reshape(B, n)
        if Bp > B or Rp * 128 > n:
            a = jnp.pad(a, ((0, Bp - B), (0, Rp * 128 - n)))
        return a.reshape(Bp, Rp, 128)

    x0f, epsf = flat_pad(x0), flat_pad(eps)

    # Hoisted schedule gather (wrapper side).
    t = t.astype(jnp.int32)
    sab = sched["sqrt_alpha_bar"][t]
    s1m = sched["sqrt_1m_alpha_bar"][t]

    def coef_pad(c):
        if Bp > B:
            c = jnp.pad(c, (0, Bp - B))
        return jnp.broadcast_to(c[:, None, None], (Bp, 1, 128)).astype(jnp.float32)

    sabf, s1mf = coef_pad(sab), coef_pad(s1m)

    big = lambda i, j: (i, j, 0)
    small = lambda i, j: (i, 0, 0)
    xtf = pl.pallas_call(
        _q_sample_kernel,
        grid=(Bp // Lt, Rp // Rt),
        in_specs=[
            pl.BlockSpec((Lt, 1, 128), small),
            pl.BlockSpec((Lt, 1, 128), small),
            pl.BlockSpec((Lt, Rt, 128), big),
            pl.BlockSpec((Lt, Rt, 128), big),
        ],
        out_specs=pl.BlockSpec((Lt, Rt, 128), big),
        out_shape=jax.ShapeDtypeStruct((Bp, Rp, 128), x0.dtype),
        compiler_params=pltpu.CompilerParams(
            dimension_semantics=("parallel", "parallel")),
    )(sabf, s1mf, x0f, epsf)

    return xtf.reshape(Bp, Rp * 128)[:B, :n].reshape(orig_shape)


# -----------------------------------------------------------------------------
# p_sample core (given e_t from the eps model):
#   x0     = sqrt_recip_alpha_bar[step] * x - sqrt_recip_m1_alpha_bar[step] * e_t
#   mean   = mean_x0_coef[step] * x0 + mean_xt_coef[step] * x
#   x_prev = mean + exp(0.5*log_var[step]) * temperature * noise   (noise=0 at step 0)
# step is a single scalar for the whole call, so all five coefficients are
# gathered in the wrapper and passed as one (5,) SMEM scalar-prefetch vector.
# -----------------------------------------------------------------------------
def _p_sample_kernel(coef_ref, x_ref, et_ref, noise_ref, *out_refs):
    sra = coef_ref[0]      # sqrt_recip_alpha_bar[step]
    srm1 = coef_ref[1]     # sqrt_recip_m1_alpha_bar[step]
    mx0 = coef_ref[2]      # mean_x0_coef[step]
    mxt = coef_ref[3]      # mean_xt_coef[step]
    std = coef_ref[4]      # exp(0.5*log_var[step]) * temperature (0 at step 0)

    x = x_ref[...].astype(jnp.float32)
    et = et_ref[...].astype(jnp.float32)
    x0 = sra * x - srm1 * et
    mean = mx0 * x0 + mxt * x
    x_prev = mean + std * noise_ref[...].astype(jnp.float32)

    out_refs[0][...] = x_prev.astype(out_refs[0].dtype)
    if len(out_refs) == 2:                   # optional predicted-x0 output
        out_refs[1][...] = x0.astype(out_refs[1].dtype)


def p_sample_core(x, e_t, noise, step, sched, *, temperature=1.0,
                  return_x0=True, donate_x=False):
    """Reverse-diffusion update. Returns x_prev (and x0 when return_x0=True)."""
    orig_shape = x.shape
    total = int(np.prod(orig_shape))
    rows = -(-total // 128)
    Rt, Rp = _pick_row_tile(rows)

    def flat_pad(a):
        a = a.reshape(total)
        if Rp * 128 > total:
            a = jnp.pad(a, (0, Rp * 128 - total))
        return a.reshape(Rp, 128)

    xf, etf, nf = flat_pad(x), flat_pad(e_t), flat_pad(noise)

    # Hoisted schedule gather + temperature fold + DDPM step-0 convention.
    step = jnp.asarray(step, jnp.int32)
    std = jnp.exp(0.5 * sched["log_var"][step]) * jnp.float32(temperature)
    std = jnp.where(step == 0, jnp.float32(0.0), std)
    coefs = jnp.stack([
        sched["sqrt_recip_alpha_bar"][step],
        sched["sqrt_recip_m1_alpha_bar"][step],
        sched["mean_x0_coef"][step],
        sched["mean_xt_coef"][step],
        std,
    ]).astype(jnp.float32)

    spec = pl.BlockSpec((Rt, 128), lambda i, c: (i, 0))
    n_out = 2 if return_x0 else 1
    grid_spec = pltpu.PrefetchScalarGridSpec(
        num_scalar_prefetch=1,
        grid=(Rp // Rt,),
        in_specs=[spec, spec, spec],
        out_specs=[spec] * n_out,
    )
    out_shape = tuple(jax.ShapeDtypeStruct((Rp, 128), x.dtype)
                      for _ in range(n_out))

    extra = {}
    if donate_x:
        # Operand indices count the scalar-prefetch arg: coefs=0, x=1, e_t=2, noise=3.
        extra["input_output_aliases"] = {1: 0}

    outs = pl.pallas_call(
        _p_sample_kernel,
        grid_spec=grid_spec,
        out_shape=out_shape,
        compiler_params=pltpu.CompilerParams(
            dimension_semantics=("parallel",)),
        **extra,
    )(coefs, xf, etf, nf)

    unflat = lambda a: a.reshape(Rp * 128)[:total].reshape(orig_shape)
    x_prev = unflat(outs[0])
    if return_x0:
        return x_prev, unflat(outs[1])
    return x_prev


# -----------------------------------------------------------------------------
# Demo / self-check
# -----------------------------------------------------------------------------
if __name__ == "__main__":
    n_steps, linear_start, linear_end = 16, 1e-4, 2e-2
    sched = make_schedule(n_steps, linear_start, linear_end)

    B, T, C, H, W = 2, 2, 4, 16, 16        # [batch, track, channels, H, W]
    key = jax.random.PRNGKey(0)
    k1, k2, k3, k4, k5 = jax.random.split(key, 5)
    x0 = jax.random.normal(k1, (B, T, C, H, W), jnp.float32)
    eps = jax.random.normal(k2, (B, T, C, H, W), jnp.float32)
    t = jax.random.randint(k3, (B,), 0, n_steps, jnp.int32)

    # --- q_sample (forward diffusion) ---
    xt = jax.block_until_ready(q_sample(x0, t, eps, sched))
    ab = sched["alpha_bar"][t].reshape(B, 1, 1, 1, 1)
    xt_ref = jnp.sqrt(ab) * x0 + jnp.sqrt(1.0 - ab) * eps
    assert np.allclose(np.asarray(xt), np.asarray(xt_ref), atol=1e-5)

    # --- p_sample core (reverse step; synthetic e_t in place of the UNet) ---
    step = 5
    e_t = jax.random.normal(k4, (B, T, C, H, W), jnp.float32)   # stand-in
    noise = jax.random.normal(k5, (B, T, C, H, W), jnp.float32)

    x_prev, x0_pred = p_sample_core(xt, e_t, noise, step, sched,
                                    temperature=1.0, return_x0=True)
    x_prev = jax.block_until_ready(x_prev)
    x0_pred = jax.block_until_ready(x0_pred)

    x0_r = (sched["sqrt_recip_alpha_bar"][step] * xt
            - sched["sqrt_recip_m1_alpha_bar"][step] * e_t)
    mean_r = (sched["mean_x0_coef"][step] * x0_r
              + sched["mean_xt_coef"][step] * xt)
    x_prev_r = mean_r + jnp.exp(0.5 * sched["log_var"][step]) * noise
    assert np.allclose(np.asarray(x0_pred), np.asarray(x0_r), atol=1e-5)
    assert np.allclose(np.asarray(x_prev), np.asarray(x_prev_r), atol=1e-5)

    # --- x_prev-only variant with x_prev aliased onto x (sampling-loop mode) ---
    p_fused = jax.jit(
        lambda x_, et_, nz_, s_: p_sample_core(
            x_, et_, nz_, s_, sched, temperature=1.0,
            return_x0=False, donate_x=True))
    x_prev_alias = jax.block_until_ready(p_fused(xt, e_t, noise, jnp.int32(step)))
    assert np.allclose(np.asarray(x_prev_alias), np.asarray(x_prev_r), atol=1e-5)

    # --- step 0: noise must be dropped (DDPM convention, folded into std) ---
    x_prev0 = jax.block_until_ready(
        p_sample_core(xt, e_t, noise, 0, sched, return_x0=False))
    x0_r0 = (sched["sqrt_recip_alpha_bar"][0] * xt
             - sched["sqrt_recip_m1_alpha_bar"][0] * e_t)
    mean_r0 = (sched["mean_x0_coef"][0] * x0_r0
               + sched["mean_xt_coef"][0] * xt)
    assert np.allclose(np.asarray(x_prev0), np.asarray(mean_r0), atol=1e-5)

    print("KERNEL_OK")
</pallas_src>

<mosaic_0001>
module attributes {stable_mosaic.version = 11 : i64} {
  func.func @_q_sample_kernel(%arg0: i32, %arg1: i32, %arg2: memref<2x1x128xf32, #tpu.memory_space<vmem>>, %arg3: memref<2x1x128xf32, #tpu.memory_space<vmem>>, %arg4: memref<2x16x128xf32, #tpu.memory_space<vmem>>, %arg5: memref<2x16x128xf32, #tpu.memory_space<vmem>>, %arg6: memref<2x16x128xf32, #tpu.memory_space<vmem>>) attributes {dimension_semantics = [#tpu.dimension_semantics<parallel>, #tpu.dimension_semantics<parallel>], iteration_bounds = array<i64: 1, 1>, scalar_prefetch = 0 : i64, scratch_operands = 0 : i64, tpu.core_type = #tpu.core_type<tc>, window_params = [{transform_indices = @transform_0, window_bounds = array<i64: 2, 1, 128>}, {transform_indices = @transform_1, window_bounds = array<i64: 2, 1, 128>}, {transform_indices = @transform_2, window_bounds = array<i64: 2, 16, 128>}, {transform_indices = @transform_3, window_bounds = array<i64: 2, 16, 128>}, {transform_indices = @transform_4, window_bounds = array<i64: 2, 16, 128>}]} {
    %c0 = arith.constant 0 : index
    %c0_0 = arith.constant 0 : index
    %c0_1 = arith.constant 0 : index
    %0 = vector.load %arg4[%c0, %c0_0, %c0_1] : memref<2x16x128xf32, #tpu.memory_space<vmem>>, vector<2x16x128xf32>
    %c0_2 = arith.constant 0 : index
    %c0_3 = arith.constant 0 : index
    %c0_4 = arith.constant 0 : index
    %1 = vector.load %arg5[%c0_2, %c0_3, %c0_4] : memref<2x16x128xf32, #tpu.memory_space<vmem>>, vector<2x16x128xf32>
    %c0_5 = arith.constant 0 : index
    %c0_6 = arith.constant 0 : index
    %c0_7 = arith.constant 0 : index
    %2 = vector.load %arg2[%c0_5, %c0_6, %c0_7] : memref<2x1x128xf32, #tpu.memory_space<vmem>>, vector<2x1x128xf32>
    %3 = vector.broadcast %2 : vector<2x1x128xf32> to vector<2x16x128xf32>
    %4 = arith.mulf %3, %0 : vector<2x16x128xf32>
    %c0_8 = arith.constant 0 : index
    %c0_9 = arith.constant 0 : index
    %c0_10 = arith.constant 0 : index
    %5 = vector.load %arg3[%c0_8, %c0_9, %c0_10] : memref<2x1x128xf32, #tpu.memory_space<vmem>>, vector<2x1x128xf32>
    %6 = vector.broadcast %5 : vector<2x1x128xf32> to vector<2x16x128xf32>
    %7 = arith.mulf %6, %1 : vector<2x16x128xf32>
    %8 = arith.addf %4, %7 : vector<2x16x128xf32>
    %c0_11 = arith.constant 0 : index
    %c0_12 = arith.constant 0 : index
    %c0_13 = arith.constant 0 : index
    %9 = vector.load %arg6[%c0_11, %c0_12, %c0_13] : memref<2x16x128xf32, #tpu.memory_space<vmem>>, vector<2x16x128xf32>
    tpu.vector_store %arg6[%c0_11, %c0_12, %c0_13], %8 {strides = array<i32>} : memref<2x16x128xf32, #tpu.memory_space<vmem>>, vector<2x16x128xf32>,
    return
  }
  func.func @transform_0(%arg0: i32, %arg1: i32) -> (i32, i32, i32) {
    %c0_i32 = arith.constant 0 : i32
    %c0_i32_0 = arith.constant 0 : i32
    %c0_i32_1 = arith.constant 0 : i32
    return %arg0, %c0_i32, %c0_i32_0 : i32, i32, i32
  }
  func.func @transform_1(%arg0: i32, %arg1: i32) -> (i32, i32, i32) {
    %c0_i32 = arith.constant 0 : i32
    %c0_i32_0 = arith.constant 0 : i32
    %c0_i32_1 = arith.constant 0 : i32
    return %arg0, %c0_i32, %c0_i32_0 : i32, i32, i32
  }
  func.func @transform_2(%arg0: i32, %arg1: i32) -> (i32, i32, i32) {
    %c0_i32 = arith.constant 0 : i32
    %c0_i32_0 = arith.constant 0 : i32
    return %arg0, %arg1, %c0_i32 : i32, i32, i32
  }
  func.func @transform_3(%arg0: i32, %arg1: i32) -> (i32, i32, i32) {
    %c0_i32 = arith.constant 0 : i32
    %c0_i32_0 = arith.constant 0 : i32
    return %arg0, %arg1, %c0_i32 : i32, i32, i32
  }
  func.func @transform_4(%arg0: i32, %arg1: i32) -> (i32, i32, i32) {
    %c0_i32 = arith.constant 0 : i32
    %c0_i32_0 = arith.constant 0 : i32
    return %arg0, %arg1, %c0_i32 : i32, i32, i32
  }
}

</mosaic_0001>

<bundles_post_ra>
// kernel: tpu_custom_call.1
= control target key start
LH: loop header
LB: loop body
LE: loop exit
PB: predicated region body
PF: predicated region fallthrough
CT: control target
= control target key end

     0   :  { %9 = vsyncpa [#allocation3], 0  ;;  %s331_s0 = inlined_call_operand.hbm [shape: f32[2,1,128], index: 0, kind: input, shape index: {}]   ;;  %s332_s1 = inlined_call_operand.vmem [shape: f32[2,1,128], index: 1, kind: input, shape index: {}]   ;;  %s333_s2 = inlined_call_operand.hbm [shape: f32[2,16,128], index: 2, kind: input, shape index: {}]   ;;  %s334_s3 = inlined_call_operand.hbm [shape: f32[2,16,128], index: 3, kind: input, shape index: {}]   ;;  %s335_s4 = inlined_call_operand.hbm [shape: f32[2,16,128], index: 4, kind: output, shape index: {}]  }
   0x1   :  { %10 = vsyncpa [#allocation6], 0 }
   0x2   :  { %11 = vsyncpa [#allocation4], 0  ;;  %s235_s15 = smov [#allocation5]   ;;  %s141_s19 = scalar_lea.hbm %s333_s2, 512 }
   0x3   :  { %s31_s16 = sshll.u32 %s235_s15, 4  ;;  %p142_p0 = scmp.ne.s32.totalorder %s333_s2, %s141_s19  ;;  %s32_s16 = int_to_ptr.vmem [resolvable:$true] %s31_s16 }
   0x4   :  { %p145_p1 = scmp.lt.u32.totalorder %s141_s19, %s333_s2 }
   0x6   :  { %p147_p2 = pnand %p145_p1, %p142_p0 }
   0x8   :  { %150 = shalt.err (!%p147_p2)
}
   0x9   :  { %s151_s24 = scalar_lea.vmem %s32_s16, 512  ;;  %p156_p4 = scmp.lt.s32.totalorder %s32_s16, %s32_s16 }
   0xa   :  { %p152_p3 = scmp.ne.s32.totalorder %s32_s16, %s151_s24  ;;  %p157_p5 = scmp.lt.s32.totalorder %s151_s24, %s151_s24 }
   0xc   :  { %p158_p6 = por %p157_p5, %p156_p4 }
   0xe   :  { %p159_p7 = pnand %p158_p6, %p152_p3 }
  0x10   :  { %162 = shalt.err (!%p159_p7)
}
  0x11   :  { %s236_s25 = smov 128   ;;  %s237_s26 = smov 8  }
  0x12   :  { %37 = dma.hbm_to_vmem [thread:$0]  %s333_s2, 512, %s32_s16, [#allocation6], %s236_s25, %s236_s25, %s237_s26  }
  0x13   :  { %s238_s29 = smov [#allocation2]   ;;  %s163_s7 = scalar_lea.hbm %s331_s0, 32 }
  0x14   :  { %s17_s30 = sshll.u32 %s238_s29, 4  ;;  %p164_p8 = scmp.ne.s32.totalorder %s331_s0, %s163_s7  ;;  %s18_s30 = int_to_ptr.vmem [resolvable:$true] %s17_s30 }
  0x15   :  { %p167_p9 = scmp.lt.u32.totalorder %s163_s7, %s331_s0 }
  0x17   :  { %p169_p10 = pnand %p167_p9, %p164_p8 }
  0x19   :  { %172 = shalt.err (!%p169_p10)
}
  0x1a   :  { %s173_s12 = scalar_lea.vmem %s18_s30, 32  ;;  %p178_p12 = scmp.lt.s32.totalorder %s18_s30, %s18_s30 }
  0x1b   :  { %p174_p11 = scmp.ne.s32.totalorder %s18_s30, %s173_s12  ;;  %p179_p13 = scmp.lt.s32.totalorder %s173_s12, %s173_s12 }
  0x1d   :  { %p180_p0 = por %p179_p13, %p178_p12 }
  0x1f   :  { %p181_p1 = pnand %p180_p0, %p174_p11 }
  0x21   :  { %184 = shalt.err (!%p181_p1)
}
  0x22   :  { %s239_s2 = smov 16   ;;  %s240_s13 = smov 1  }
  0x23   :  { %23 = dma.hbm_to_vmem [thread:$0]  %s331_s0, 32, %s18_s30, [#allocation3], %s239_s2, %s239_s2, %s240_s13  }
  0x24   :  { %s241_s16 = smov [#allocation7]   ;;  %s185_s20 = scalar_lea.hbm %s334_s3, 512 }
  0x25   :  { %s43_s17 = sshll.u32 %s241_s16, 4  ;;  %p186_p2 = scmp.ne.s32.totalorder %s334_s3, %s185_s20  ;;  %s44_s17 = int_to_ptr.vmem [resolvable:$true] %s43_s17 }
  0x26   :  { %p189_p3 = scmp.lt.u32.totalorder %s185_s20, %s334_s3 }
  0x28   :  { %p191_p4 = pnand %p189_p3, %p186_p2 }
  0x2a   :  { %194 = shalt.err (!%p191_p4)
}
  0x2b   :  { %s195_s27 = scalar_lea.vmem %s44_s17, 512  ;;  %p200_p6 = scmp.lt.s32.totalorder %s44_s17, %s44_s17 }
  0x2c   :  { %p196_p5 = scmp.ne.s32.totalorder %s44_s17, %s195_s27  ;;  %p201_p7 = scmp.lt.s32.totalorder %s195_s27, %s195_s27 }
  0x2e   :  { %p202_p8 = por %p201_p7, %p200_p6 }
  0x30   :  { %p203_p9 = pnand %p202_p8, %p196_p5 }
  0x32   :  { %206 = shalt.err (!%p203_p9)
}
  0x33   :  { %49 = dma.hbm_to_vmem [thread:$0]  %s334_s3, 512, %s44_s17, [#allocation6], %s236_s25, %s236_s25, %s237_s26  }
  0x34   :  { %229 = dma.done.wait [#allocation3], 32  }
  0x35   :  { %230 = vsyncadd [#allocation3], 4294967264 }
  0x36   :  { %231 = dma.done.wait [#allocation6], 1024  }
  0x37   :  { %232 = vsyncadd [#allocation6], 4294966272  ;;  %v59_v0 = vld [vmem:[#allocation5] sm:$0xff]  ;;  %v129_v2 = vld [vmem:[#allocation2] ss:$0 sm:$0xff]  ;;  %s242_s6 = smov [#allocation8]  }
  0x38   :  { %v63_v1 = vld [vmem:[#allocation7] sm:$0xff]  ;;  %v81_v3 = vmul.f32 %v129_v2, %v59_v0  ;;  %v131_v4 = vld [vmem:[%s332_s1] ss:$0 sm:$0xff]  ;;  %v60_v5 = vld [vmem:[#allocation5 + $0x8] sm:$0xff]  ;;  %s116_s7 = sshll.u32 %s242_s6, 4  ;;  %s117_s7 = int_to_ptr.vmem [resolvable:$true] %s116_s7 }
  0x39   :  { %v64_v6 = vld [vmem:[#allocation7 + $0x8] sm:$0xff]  ;;  %v99_v7 = vmul.f32 %v131_v4, %v63_v1  ;;  %v82_v8 = vmul.f32 %v129_v2, %v60_v5  ;;  %v61_v10 = vld [vmem:[#allocation5 + $0x10] sm:$0xff]  ;;  %v130_v12 = vld [vmem:[#allocation2 + $0x1] ss:$0 sm:$0xff]  ;;  %s207_s8 = scalar_lea.vmem %s117_s7, 512  ;;  %p212_p11 = scmp.lt.s32.totalorder %s117_s7, %s117_s7 }
  0x3a   :  { %v100_v9 = vmul.f32 %v131_v4, %v64_v6  ;;  %v65_v11 = vld [vmem:[#allocation7 + $0x10] sm:$0xff]  ;;  %v83_v13 = vmul.f32 %v130_v12, %v61_v10  ;;  %v132_v14 = vld [vmem:[%s332_s1 + $0x1] ss:$0 sm:$0xff]  ;;  %p208_p10 = scmp.ne.s32.totalorder %s117_s7, %s207_s8  ;;  %p213_p12 = scmp.lt.s32.totalorder %s207_s8, %s207_s8 }
  0x3b   :  { %v62_v15 = vld [vmem:[#allocation5 + $0x18] sm:$0xff]  ;;  %v103_v17 = vadd.f32 %v99_v7, %v81_v3  ;;  %v101_v19 = vmul.f32 %v132_v14, %v65_v11 }
  0x3c   :  { %v66_v16 = vld [vmem:[#allocation7 + $0x18] sm:$0xff]  ;;  %v104_v18 = vadd.f32 %v100_v9, %v82_v8  ;;  %v84_v20 = vmul.f32 %v130_v12, %v62_v15  ;;  %p214_p13 = por %p213_p12, %p212_p11 }
  0x3d   :  { %v102_v21 = vmul.f32 %v132_v14, %v66_v16  ;;  %107 = vst [vmem:[#allocation8] sm:$0xff] %v103_v17  ;;  %v105_v22 = vadd.f32 %v101_v19, %v83_v13 }
  0x3e   :  { %108 = vst [vmem:[#allocation8 + $0x8] sm:$0xff] %v104_v18  ;;  %p215_p0 = pnand %p214_p13, %p208_p10 }
  0x3f   :  { %v106_v23 = vadd.f32 %v102_v21, %v84_v20  ;;  %109 = vst [vmem:[#allocation8 + $0x10] sm:$0xff] %v105_v22 }
  0x41   :  { %110 = vst [vmem:[#allocation8 + $0x18] sm:$0xff] %v106_v23 }
  0x42   :  { %218 = shalt.err (!%p215_p0)
}
  0x43   :  { %s219_s10 = scalar_lea.hbm %s335_s4, 512 }
  0x44   :  { %p220_p1 = scmp.ne.s32.totalorder %s335_s4, %s219_s10  ;;  %p223_p2 = scmp.lt.u32.totalorder %s219_s10, %s335_s4 }
  0x46   :  { %p225_p3 = pnand %p223_p2, %p220_p1 }
  0x48   :  { %228 = shalt.err (!%p225_p3)
}
  0x49   :  { %122 = dma.vmem_to_hbm [thread:$0]  %s117_s7, 512, %s335_s4, [#allocation4], %s236_s25, %s236_s25, %s237_s26  }
  0x4a   :  { %233 = dma.done.wait [#allocation4], 512  }
  0x4b   :  { %234 = vsyncadd [#allocation4], 4294966784 }
  0x4c   :  { %126 = vsyncpa [#allocation3], 1 }
  0x4d   :  { %127 = vsyncpa [#allocation6], 1 }
  0x4e   :  { %128 = vsyncpa [#allocation4], 1 }

</bundles_post_ra>
